<compile_context>
chip_gen: v6e
topology: v6e:2x2x1
jax: 0.10.0
libtpu: 0.0.40
codegen_flags: <defaults>
</compile_context>

<pallas_src>
import functools

import jax
import jax.numpy as jnp
from jax.experimental import pallas as pl
from jax.experimental.pallas import tpu as pltpu


def _round_up(x, m):
    return ((x + m - 1) // m) * m


# ---------------------------------------------------------------------------
# Fast path: weight resident in VMEM, grid over batch tiles only.
# ---------------------------------------------------------------------------
def _resident_kernel(x_ref, w_ref, b_ref, o_ref):
    # x_ref: (tm, F)  w_ref: (F, C_p)  b_ref: (1, C_p)  o_ref: (tm, C_p)
    o_ref[...] = (
        b_ref[...]
        + jnp.dot(x_ref[...], w_ref[...], preferred_element_type=jnp.float32)
    ).astype(o_ref.dtype)


def _forward_resident(x, w_t, b2d, tm):
    B, F = x.shape
    _, C_p = w_t.shape
    grid_m = pl.cdiv(B, tm)

    cost = pl.CostEstimate(
        flops=2 * B * F * C_p,
        # Weight/bias DMA'd once (constant block index), x read once, out written once.
        bytes_accessed=4 * (B * F + F * C_p + C_p + B * C_p),
        transcendentals=0,
    )

    return pl.pallas_call(
        _resident_kernel,
        out_shape=jax.ShapeDtypeStruct((B, C_p), x.dtype),
        grid_spec=pltpu.PrefetchScalarGridSpec(
            num_scalar_prefetch=0,
            grid=(grid_m,),
            in_specs=[
                pl.BlockSpec((tm, F), lambda i: (i, 0)),    # x: streamed once
                pl.BlockSpec((F, C_p), lambda i: (0, 0)),   # weight^T: VMEM-resident
                pl.BlockSpec((1, C_p), lambda i: (0, 0)),   # bias: VMEM-resident
            ],
            out_specs=pl.BlockSpec((tm, C_p), lambda i: (i, 0)),
        ),
        compiler_params=pltpu.CompilerParams(
            dimension_semantics=("parallel",),
            vmem_limit_bytes=40 * 1024 * 1024,
        ),
        cost_estimate=cost,
    )(x, w_t, b2d)


# ---------------------------------------------------------------------------
# Fallback path: classic 3-D tiled matmul grid for very large F * C.
# ---------------------------------------------------------------------------
def _tiled_kernel(x_ref, w_ref, b_ref, o_ref, acc_ref, *, f_valid, tk):
    k = pl.program_id(2)

    @pl.when(k == 0)
    def _():
        # Fold the bias into the accumulator init (no epilogue broadcast-add).
        acc_ref[...] = jnp.broadcast_to(
            b_ref[...].astype(jnp.float32), acc_ref.shape)

    x = x_ref[...]
    if f_valid % tk:
        # x is NOT host-padded along F: mask the feature remainder so out-of-bounds
        # HBM bytes cannot leak into the accumulation.  The weight is zero-padded
        # along F on the host, so masked-x(=0) * padded-w(=0) is exactly 0.
        col = jax.lax.broadcasted_iota(jnp.int32, x.shape, 1)
        x = jnp.where(k * tk + col < f_valid, x, jnp.zeros_like(x))

    acc_ref[...] += jnp.dot(x, w_ref[...], preferred_element_type=jnp.float32)

    @pl.when(k == pl.num_programs(2) - 1)
    def _():
        o_ref[...] = acc_ref[...].astype(o_ref.dtype)


def _forward_tiled(x_in, w_t, b2d, tm, tn, tk, f_valid):
    B = x_in.shape[0]
    F_p, C_p = w_t.shape
    grid = (pl.cdiv(B, tm), C_p // tn, F_p // tk)

    cost = pl.CostEstimate(
        flops=2 * B * F_p * C_p,
        bytes_accessed=4 * (B * F_p * (C_p // tn)            # x re-read per class tile
                            + F_p * C_p * pl.cdiv(B, tm)     # w re-read per batch tile
                            + C_p + B * C_p),
        transcendentals=0,
    )

    kernel = functools.partial(_tiled_kernel, f_valid=f_valid, tk=tk)

    return pl.pallas_call(
        kernel,
        out_shape=jax.ShapeDtypeStruct((B, C_p), x_in.dtype),
        grid_spec=pltpu.PrefetchScalarGridSpec(
            num_scalar_prefetch=0,
            grid=grid,
            in_specs=[
                pl.BlockSpec((tm, tk), lambda i, j, k: (i, k)),   # x
                pl.BlockSpec((tk, tn), lambda i, j, k: (k, j)),   # weight^T (F, C)
                pl.BlockSpec((1, tn), lambda i, j, k: (0, j)),    # bias
            ],
            out_specs=pl.BlockSpec((tm, tn), lambda i, j, k: (i, j)),
            scratch_shapes=[pltpu.VMEM((tm, tn), jnp.float32)],
        ),
        compiler_params=pltpu.CompilerParams(
            dimension_semantics=("parallel", "parallel", "arbitrary"),
            vmem_limit_bytes=40 * 1024 * 1024,
        ),
        cost_estimate=cost,
    )(x_in, w_t, b2d)


# ---------------------------------------------------------------------------
# Public wrapper: y = x @ weight.T + bias  (nn.Linear forward)
# ---------------------------------------------------------------------------
def logistic_regression_forward(x, weight, bias):
    """x: (B, F), weight: (C, F) [PyTorch nn.Linear layout], bias: (C,) -> (B, C)."""
    B, F = x.shape
    C, Fw = weight.shape
    assert F == Fw, "weight must be (n_classes, n_features)"
    assert bias.shape == (C,)

    # Batch tile: multiple of 8 sublanes; split into >= 2 tiles when possible so
    # both of v7x's TensorCores get work; cap at 512 rows.
    if B <= 8:
        tm = _round_up(B, 8)
    else:
        tm = min(512, _round_up(pl.cdiv(B, 2), 8))

    C_p = _round_up(C, 128)   # lane-dense output / weight columns
    itemsize = 4

    # Fast-path VMEM budget (worst case: everything double-buffered), f32.
    resident_bytes = itemsize * (2 * F * C_p + 2 * tm * F + 2 * tm * C_p + 2 * C_p)

    if resident_bytes <= 24 * 1024 * 1024:
        # One-time host prep of the static weight: transpose to (F, C) so the MXU
        # sees a native (K, N) RHS, zero-pad classes to a lane-dense multiple of 128.
        w_t = weight.T
        if C_p != C:
            w_t = jnp.pad(w_t, ((0, 0), (0, C_p - C)))
            b_p = jnp.pad(bias, (0, C_p - C))
        else:
            b_p = bias
        out_padded = _forward_resident(x, w_t, b_p.reshape(1, C_p), tm)
    else:
        # Large-weight fallback: 3-D tiled grid, ~11 MiB live with double buffering.
        tn = min(512, C_p)
        tk = min(1024, _round_up(F, 128))
        C_pb = _round_up(C, tn)
        F_pb = _round_up(F, tk)
        w_t = jnp.pad(weight.T, ((0, F_pb - F), (0, C_pb - C)))
        b2d = jnp.pad(bias, (0, C_pb - C)).reshape(1, C_pb)
        if F < tk:
            # Degenerate case (tiny F, huge C): pad x once so the single K block fits.
            x_in, f_valid = jnp.pad(x, ((0, 0), (0, tk - F))), tk
        else:
            x_in, f_valid = x, F
        out_padded = _forward_tiled(x_in, w_t, b2d, tm, tn, tk, f_valid)

    return out_padded[:B, :C]


if __name__ == "__main__":
    # Small, deterministic problem: batch=8, n_features=32, n_classes=16.
    batch, n_features, n_classes = 8, 32, 16

    key = jax.random.PRNGKey(0)
    kx, kw, kb = jax.random.split(key, 3)

    x = jax.random.normal(kx, (batch, n_features), dtype=jnp.float32)
    # Deterministic init mirroring nn.Linear parameter shapes:
    #   weight: (n_classes, n_features), bias: (n_classes,)
    bound = 1.0 / (n_features ** 0.5)
    weight = jax.random.uniform(
        kw, (n_classes, n_features), minval=-bound, maxval=bound, dtype=jnp.float32)
    bias = jax.random.uniform(
        kb, (n_classes,), minval=-bound, maxval=bound, dtype=jnp.float32)

    out = logistic_regression_forward(x, weight, bias)
    out = jax.block_until_ready(out)

    # Reference check against plain JAX (same math as nn.Linear forward).
    ref = x @ weight.T + bias
    assert out.shape == (batch, n_classes)
    assert jnp.allclose(out, ref, atol=1e-5, rtol=1e-5)

    print("KERNEL_OK")
</pallas_src>

<mosaic_0001>
module attributes {stable_mosaic.version = 11 : i64} {
  func.func @_resident_kernel(%arg0: i32, %arg1: memref<8x32xf32, #tpu.memory_space<vmem>>, %arg2: memref<32x128xf32, #tpu.memory_space<vmem>>, %arg3: memref<1x128xf32, #tpu.memory_space<vmem>>, %arg4: memref<8x128xf32, #tpu.memory_space<vmem>>) attributes {dimension_semantics = [#tpu.dimension_semantics<parallel>], iteration_bounds = array<i64: 1>, scalar_prefetch = 0 : i64, scratch_operands = 0 : i64, tpu.core_type = #tpu.core_type<tc>, window_params = [{transform_indices = @transform_0, window_bounds = array<i64: 8, 32>}, {pipeline_mode = #tpu.pipeline_mode<synchronous>, transform_indices = @transform_1, window_bounds = array<i64: 32, 128>}, {pipeline_mode = #tpu.pipeline_mode<synchronous>, transform_indices = @transform_2, window_bounds = array<i64: 1, 128>}, {transform_indices = @transform_3, window_bounds = array<i64: 8, 128>}]} {
    %c0 = arith.constant 0 : index
    %c0_0 = arith.constant 0 : index
    %0 = vector.load %arg3[%c0, %c0_0] : memref<1x128xf32, #tpu.memory_space<vmem>>, vector<1x128xf32>
    %c0_1 = arith.constant 0 : index
    %c0_2 = arith.constant 0 : index
    %1 = vector.load %arg1[%c0_1, %c0_2] : memref<8x32xf32, #tpu.memory_space<vmem>>, vector<8x32xf32>
    %c0_3 = arith.constant 0 : index
    %c0_4 = arith.constant 0 : index
    %2 = vector.load %arg2[%c0_3, %c0_4] : memref<32x128xf32, #tpu.memory_space<vmem>>, vector<32x128xf32>
    %cst = arith.constant dense<0.000000e+00> : vector<8x128xf32>
    %3 = tpu.matmul %1, %2, %cst {dimension_numbers = #tpu.dot_dimension_numbers<[1], [0], [0], [1], [0, 0, 1, 1], [], []>} : vector<8x32xf32>, vector<32x128xf32>, vector<8x128xf32> -> vector<8x128xf32>
    %4 = vector.broadcast %0 : vector<1x128xf32> to vector<8x128xf32>
    %5 = arith.addf %4, %3 : vector<8x128xf32>
    %c0_5 = arith.constant 0 : index
    %c0_6 = arith.constant 0 : index
    %6 = vector.load %arg4[%c0_5, %c0_6] : memref<8x128xf32, #tpu.memory_space<vmem>>, vector<8x128xf32>
    tpu.vector_store %arg4[%c0_5, %c0_6], %5 {strides = array<i32>} : memref<8x128xf32, #tpu.memory_space<vmem>>, vector<8x128xf32>,
    return
  }
  func.func @transform_0(%arg0: i32) -> (i32, i32) {
    %c0_i32 = arith.constant 0 : i32
    %c0_i32_0 = arith.constant 0 : i32
    return %arg0, %c0_i32 : i32, i32
  }
  func.func @transform_1(%arg0: i32) -> (i32, i32) {
    %c0_i32 = arith.constant 0 : i32
    %c0_i32_0 = arith.constant 0 : i32
    %c0_i32_1 = arith.constant 0 : i32
    return %c0_i32, %c0_i32_0 : i32, i32
  }
  func.func @transform_2(%arg0: i32) -> (i32, i32) {
    %c0_i32 = arith.constant 0 : i32
    %c0_i32_0 = arith.constant 0 : i32
    %c0_i32_1 = arith.constant 0 : i32
    return %c0_i32, %c0_i32_0 : i32, i32
  }
  func.func @transform_3(%arg0: i32) -> (i32, i32) {
    %c0_i32 = arith.constant 0 : i32
    %c0_i32_0 = arith.constant 0 : i32
    return %arg0, %c0_i32 : i32, i32
  }
}

</mosaic_0001>

<bundles_post_ra>
// kernel: tpu_custom_call.1
= control target key start
LH: loop header
LB: loop body
LE: loop exit
PB: predicated region body
PF: predicated region fallthrough
CT: control target
= control target key end

     0   :  { %8 = vsyncpa [#allocation3], 0  ;;  %s275_s0 = inlined_call_operand.hbm [shape: f32[8,32], index: 0, kind: input, shape index: {}]   ;;  %s276_s1 = inlined_call_operand.hbm [shape: f32[32,128], index: 1, kind: input, shape index: {}]   ;;  %s277_s2 = inlined_call_operand.vmem [shape: f32[1,128], index: 2, kind: input, shape index: {}]   ;;  %s278_s3 = inlined_call_operand.hbm [shape: f32[8,128], index: 3, kind: output, shape index: {}]  }
   0x1   :  { %9 = vsyncpa [#allocation6], 0 }
   0x2   :  { %10 = vsyncpa [#allocation4], 0  ;;  %s236_s12 = smov [#allocation2]   ;;  %s237_s14 = smov [#allocation5]  }
   0x3   :  { %s17_s13 = sshll.u32 %s236_s12, 4  ;;  %s26_s15 = sshll.u32 %s237_s14, 4  ;;  %s18_s13 = int_to_ptr.vmem [resolvable:$true] %s17_s13  ;;  %s27_s15 = int_to_ptr.vmem [resolvable:$true] %s26_s15 }
   0x4   :  { %s178_s16 = scalar_lea.vmem %s18_s13, 128  ;;  %p183_p1 = scmp.lt.s32.totalorder %s18_s13, %s18_s13 }
   0x5   :  { %p179_p0 = scmp.ne.s32.totalorder %s18_s13, %s178_s16  ;;  %p184_p2 = scmp.lt.s32.totalorder %s178_s16, %s178_s16 }
   0x7   :  { %p185_p3 = por %p184_p2, %p183_p1 }
   0x9   :  { %p186_p4 = pnand %p185_p3, %p179_p0 }
   0xb   :  { %189 = shalt.err (!%p186_p4)
}
   0xc   :  { %20 = dma.hbm_to_vmem [thread:$0]  %s275_s0, 128, %s18_s13, [#allocation3]  }
   0xd   :  { %s198_s19 = scalar_lea.vmem %s27_s15, 512  ;;  %p203_p6 = scmp.lt.s32.totalorder %s27_s15, %s27_s15 }
   0xe   :  { %p199_p5 = scmp.ne.s32.totalorder %s27_s15, %s198_s19  ;;  %p204_p7 = scmp.lt.s32.totalorder %s198_s19, %s198_s19 }
  0x10   :  { %p205_p8 = por %p204_p7, %p203_p6 }
  0x12   :  { %p206_p9 = pnand %p205_p8, %p199_p5 }
  0x14   :  { %209 = shalt.err (!%p206_p9)
}
  0x15   :  { %s238_s20 = smov 128   ;;  %s239_s21 = smov 8  }
  0x16   :  { %32 = dma.hbm_to_vmem [thread:$0]  %s276_s1, 512, %s27_s15, [#allocation6], %s238_s20, %s238_s20, %s239_s21  }
  0x17   :  { %230 = dma.done.wait [#allocation3], 128  }
  0x18   :  { %231 = vsyncadd [#allocation3], 4294967168 }
  0x19   :  { %232 = dma.done.wait [#allocation6], 512  }
  0x1a   :  { %233 = vsyncadd [#allocation6], 4294966784  ;;  %v240_v0 = vmov 0.0   ;;  %vm241_vm0 = vmmov 0   ;;  %v46_v1 = vld [vmem:[#allocation5 + $0x18] sm:$0xff]  ;;  %v45_v2 = vld [vmem:[#allocation5 + $0x10] sm:$0xff] }
  0x1b   :  { %152 = vmatprep.subr.mxu0 %v240_v0  ;;  %160 = vmatprep.mubr.msk.f32.mxu0 %vm241_vm0, %v240_v0  ;;  %v44_v3 = vld [vmem:[#allocation5 + $0x8] sm:$0xff]  ;;  %v43_v4 = vld [vmem:[#allocation5] sm:$0xff]  ;;  %v42_v5 = vld [vmem:[#allocation2] sm:$0xff]  ;;  %vm47_vm1 = vcmask 261120   ;;  %s242_s24 = smov [#allocation7]  }
  0x1c   :  { %153 = vmatpush3.msra.mxu0 %v46_v1  ;;  %v146_v6 = vld [vmem:[%s277_s2] ss:$0 sm:$0xff]  ;;  %s135_s25 = sshll.u32 %s242_s24, 4  ;;  %s136_s25 = int_to_ptr.vmem [resolvable:$true] %s135_s25 }
  0x1d   :  { %154 = vmatprep.subr.mxu0 %v240_v0  ;;  %s210_s26 = scalar_lea.vmem %s136_s25, 128  ;;  %p215_p11 = scmp.lt.s32.totalorder %s136_s25, %s136_s25 }
  0x1e   :  { %155 = vmatpush3.msra.mxu0 %v45_v2  ;;  %p211_p10 = scmp.ne.s32.totalorder %s136_s25, %s210_s26  ;;  %p216_p12 = scmp.lt.s32.totalorder %s210_s26, %s210_s26 }
  0x1f   :  { %156 = vmatprep.subr.mxu0 %v240_v0 }
  0x20   :  { %157 = vmatpush3.msra.mxu0 %v44_v3  ;;  %p217_p13 = por %p216_p12, %p215_p11 }
  0x21   :  { %158 = vmatprep.subr.mxu0 %v240_v0 }
  0x22   :  { %159 = vmatpush3.msra.mxu0 %v43_v4  ;;  %p218_p0 = pnand %p217_p13, %p211_p10 }
  0x23   :  { %161 = vmatmul.mubr.msk.f32.vlgmr.msra.gmra.mxu0 %vm47_vm1, %v42_v5 }
  0xe3   :  { %v117_v7 = vpop.f32.mrf.mxu0 }
  0xe4   :  { %v127_v8 = vadd.f32 %v146_v6, %v117_v7 }
  0xe5   :  { %v162_v9 = vpop.f32.mrf.mxu0 }
  0xe6   :  { %128 = vst [vmem:[#allocation7] sm:$0xff] %v127_v8 }
  0xe7   :  { %221 = shalt.err (!%p218_p0)
}
  0xe8   :  { %138 = dma.vmem_to_hbm [thread:$0]  %s136_s25, 128, %s278_s3, [#allocation4]  }
  0xe9   :  { %234 = dma.done.wait [#allocation4], 128  }
  0xea   :  { %235 = vsyncadd [#allocation4], 4294967168 }
  0xeb   :  { %142 = vsyncpa [#allocation3], 1 }
  0xec   :  { %143 = vsyncpa [#allocation6], 1 }
  0xed   :  { %144 = vsyncpa [#allocation4], 1 }

</bundles_post_ra>
